<compile_context>
chip_gen: v6e
topology: v6e:2x2x1
jax: 0.10.0
libtpu: 0.0.40
codegen_flags: <defaults>
</compile_context>

<pallas_src>
import functools
import numpy as np
import jax
import jax.numpy as jnp
from jax.experimental import pallas as pl
from jax.experimental.pallas import tpu as pltpu


# ------------------------------------------------------------------
# Pallas kernel: (mb, K) f32 x (K, Dout) bf16 -> (mb, Dout) f32 on the MXU.
# Activation cast to bf16 in-kernel; f32 accumulation; f32 bias add (VPU).
# ------------------------------------------------------------------
def _dense_kernel(x_ref, w_ref, b_ref, o_ref):
    acc = jnp.dot(
        x_ref[...].astype(jnp.bfloat16),   # explicit bf16 x bf16 -> bf16 MXU path
        w_ref[...],
        preferred_element_type=jnp.float32,
    )
    o_ref[...] = acc + b_ref[...]


def prepare_dense_params(w, b):
    """One-time prep: torch-layout (Dout, Din) weight -> bf16 (Din, Dout) slab,
    bias -> f32 (1, Dout) row.  No padding: last block dim == full array dim is
    a legal BlockSpec, and the true-width output halves write traffic."""
    dout, din = w.shape
    w_slab = jnp.asarray(w, jnp.float32).T.astype(jnp.bfloat16)   # (din, dout)
    b_row = jnp.asarray(b, jnp.float32).reshape(1, dout)          # (1, dout)
    return w_slab, b_row


@functools.partial(jax.jit, static_argnames=("block_rows",))
def dense_forward(x, w_slab, b_row, *, block_rows=1024):
    """x: (..., Din) f32 -> (..., Dout, 1, 1) f32
    (== nn.Linear(Din, Dout)(x)[..., None, None])."""
    lead = x.shape[:-1]
    din = x.shape[-1]
    kp, dout = w_slab.shape
    assert din == kp, (din, kp)

    x2 = x.reshape(-1, din)
    m = x2.shape[0]

    if m <= block_rows:
        # block_shape == full array dims is legal -> single block, no padding.
        mb, gm = m, 1
    else:
        # Tiled M, ragged final block: Pallas masks the out-of-range output
        # stores; garbage rows read past m never reach HBM.
        mb, gm = block_rows, pl.cdiv(m, block_rows)

    cost = pl.CostEstimate(
        flops=2 * m * din * dout,
        bytes_accessed=m * din * 4 + din * dout * 2 + m * dout * 4,
        transcendentals=0,
    )

    out = pl.pallas_call(
        _dense_kernel,
        out_shape=jax.ShapeDtypeStruct((m, dout), jnp.float32),
        grid=(gm,),
        in_specs=[
            pl.BlockSpec((mb, din), lambda i: (i, 0)),    # activation tiles
            pl.BlockSpec((din, dout), lambda i: (0, 0)),  # weight, VMEM-resident
            pl.BlockSpec((1, dout), lambda i: (0, 0)),    # bias row, VMEM-resident
        ],
        out_specs=pl.BlockSpec((mb, dout), lambda i: (i, 0)),
        compiler_params=pltpu.CompilerParams(
            dimension_semantics=("parallel",)),           # shards M across v7x TCs
        cost_estimate=cost,
    )(x2, w_slab, b_row)

    y = out.reshape(*lead, dout)
    # Trailing [..., None, None] of the PyTorch module: metadata-only reshape.
    return y[..., None, None]


if __name__ == "__main__":
    key = jax.random.PRNGKey(0)
    k_w, k_b, k_x, k_x2 = jax.random.split(key, 4)

    # Shapes consistent with how Dense is used in ScoreNet32:
    # Dense(embed_dim=256, channels[1]=64) applied to a (B, 256) time embedding.
    B, DIN, DOUT = 2, 256, 64
    bound = 1.0 / np.sqrt(DIN)  # PyTorch nn.Linear default init range
    w = jax.random.uniform(k_w, (DOUT, DIN), jnp.float32, minval=-bound, maxval=bound)
    b = jax.random.uniform(k_b, (DOUT,), jnp.float32, minval=-bound, maxval=bound)
    x = jax.random.normal(k_x, (B, DIN), jnp.float32)

    w_slab, b_row = prepare_dense_params(w, b)

    # Small-batch (single-block) path — the actual ScoreNet usage.
    y = dense_forward(x, w_slab, b_row)
    y = jax.block_until_ready(y)
    assert y.shape == (B, DOUT, 1, 1), y.shape
    ref = (x @ w.T + b)[..., None, None]
    err = float(jnp.max(jnp.abs(y - ref)))
    assert np.isfinite(err) and err < 0.25, err  # bf16-operand / f32-accum tolerance

    # Tiled path with a ragged final block (no host-side row padding).
    M2 = 200
    x_big = jax.random.normal(k_x2, (M2, DIN), jnp.float32)
    y2 = jax.block_until_ready(dense_forward(x_big, w_slab, b_row, block_rows=128))
    assert y2.shape == (M2, DOUT, 1, 1), y2.shape
    ref2 = (x_big @ w.T + b)[..., None, None]
    err2 = float(jnp.max(jnp.abs(y2 - ref2)))
    assert np.isfinite(err2) and err2 < 0.25, err2

    print("KERNEL_OK")
</pallas_src>

<mosaic_0001>
module attributes {stable_mosaic.version = 11 : i64} {
  func.func @_dense_kernel(%arg0: i32, %arg1: memref<2x256xf32, #tpu.memory_space<vmem>>, %arg2: memref<256x64xbf16, #tpu.memory_space<vmem>>, %arg3: memref<1x64xf32, #tpu.memory_space<vmem>>, %arg4: memref<2x64xf32, #tpu.memory_space<vmem>>) attributes {dimension_semantics = [#tpu.dimension_semantics<parallel>], iteration_bounds = array<i64: 1>, scalar_prefetch = 0 : i64, scratch_operands = 0 : i64, tpu.core_type = #tpu.core_type<tc>, window_params = [{transform_indices = @transform_0, window_bounds = array<i64: 2, 256>}, {pipeline_mode = #tpu.pipeline_mode<synchronous>, transform_indices = @transform_1, window_bounds = array<i64: 256, 64>}, {pipeline_mode = #tpu.pipeline_mode<synchronous>, transform_indices = @transform_2, window_bounds = array<i64: 1, 64>}, {transform_indices = @transform_3, window_bounds = array<i64: 2, 64>}]} {
    %c0 = arith.constant 0 : index
    %c0_0 = arith.constant 0 : index
    %0 = vector.load %arg1[%c0, %c0_0] : memref<2x256xf32, #tpu.memory_space<vmem>>, vector<2x256xf32>
    %1 = arith.truncf %0 : vector<2x256xf32> to vector<2x256xbf16>
    %c0_1 = arith.constant 0 : index
    %c0_2 = arith.constant 0 : index
    %2 = vector.load %arg2[%c0_1, %c0_2] : memref<256x64xbf16, #tpu.memory_space<vmem>>, vector<256x64xbf16>
    %cst = arith.constant dense<0.000000e+00> : vector<2x64xf32>
    %3 = tpu.matmul %1, %2, %cst {dimension_numbers = #tpu.dot_dimension_numbers<[1], [0], [0], [1], [0, 0, 1, 1], [], []>} : vector<2x256xbf16>, vector<256x64xbf16>, vector<2x64xf32> -> vector<2x64xf32>
    %c0_3 = arith.constant 0 : index
    %c0_4 = arith.constant 0 : index
    %4 = vector.load %arg3[%c0_3, %c0_4] : memref<1x64xf32, #tpu.memory_space<vmem>>, vector<1x64xf32>
    %5 = vector.broadcast %4 : vector<1x64xf32> to vector<2x64xf32>
    %6 = arith.addf %3, %5 : vector<2x64xf32>
    %c0_5 = arith.constant 0 : index
    %c0_6 = arith.constant 0 : index
    %7 = vector.load %arg4[%c0_5, %c0_6] : memref<2x64xf32, #tpu.memory_space<vmem>>, vector<2x64xf32>
    tpu.vector_store %arg4[%c0_5, %c0_6], %6 {strides = array<i32>} : memref<2x64xf32, #tpu.memory_space<vmem>>, vector<2x64xf32>,
    return
  }
  func.func @transform_0(%arg0: i32) -> (i32, i32) {
    %c0_i32 = arith.constant 0 : i32
    %c0_i32_0 = arith.constant 0 : i32
    return %arg0, %c0_i32 : i32, i32
  }
  func.func @transform_1(%arg0: i32) -> (i32, i32) {
    %c0_i32 = arith.constant 0 : i32
    %c0_i32_0 = arith.constant 0 : i32
    %c0_i32_1 = arith.constant 0 : i32
    return %c0_i32, %c0_i32_0 : i32, i32
  }
  func.func @transform_2(%arg0: i32) -> (i32, i32) {
    %c0_i32 = arith.constant 0 : i32
    %c0_i32_0 = arith.constant 0 : i32
    %c0_i32_1 = arith.constant 0 : i32
    return %c0_i32, %c0_i32_0 : i32, i32
  }
  func.func @transform_3(%arg0: i32) -> (i32, i32) {
    %c0_i32 = arith.constant 0 : i32
    %c0_i32_0 = arith.constant 0 : i32
    return %arg0, %c0_i32 : i32, i32
  }
}

</mosaic_0001>

<bundles_post_ra>
// kernel: dense_forward.1
= control target key start
LH: loop header
LB: loop body
LE: loop exit
PB: predicated region body
PF: predicated region fallthrough
CT: control target
= control target key end

     0   :  { %s378_s0 = inlined_call_operand.vmem [shape: f32[2,256], index: 0, kind: input, shape index: {}]   ;;  %s379_s1 = inlined_call_operand.vmem [shape: bf16[256,64], index: 1, kind: input, shape index: {}]   ;;  %s380_s2 = inlined_call_operand.vmem [shape: f32[1,64], index: 2, kind: input, shape index: {}]   ;;  %s381_s3 = inlined_call_operand.hbm [shape: f32[2,64], index: 3, kind: output, shape index: {}]  }
   0x1   :  { %v262_v0 = vld [vmem:[%s379_s1 + $0x78] sm:$0xff]   ;;  %v264_v2 = vld [vmem:[%s379_s1 + $0x70] sm:$0xff]   ;;  %v266_v4 = vld [vmem:[%s379_s1 + $0x68] sm:$0xff]  }
   0x2   :  { %v263_v1 = vld [vmem:[%s379_s1 + $0x38] sm:$0xff]   ;;  %239 = vmatprep.subr.bf16.mxu0 %v262_v0  ;;  %v265_v3 = vld [vmem:[%s379_s1 + $0x30] sm:$0xff]   ;;  %v267_v5 = vld [vmem:[%s379_s1 + $0x28] sm:$0xff]  }
   0x3   :  { %240 = vmatpush3.bf16.msra.mxu0 %v263_v1  ;;  %v268_v6 = vld [vmem:[%s379_s1 + $0x60] sm:$0xff]   ;;  %v270_v8 = vld [vmem:[%s379_s1 + $0x58] sm:$0xff]   ;;  %v272_v10 = vld [vmem:[%s379_s1 + $0x50] sm:$0xff]  }
   0x4   :  { %241 = vmatprep.subr.bf16.mxu0 %v264_v2  ;;  %v269_v7 = vld [vmem:[%s379_s1 + $0x20] sm:$0xff]   ;;  %v271_v9 = vld [vmem:[%s379_s1 + $0x18] sm:$0xff]  }
   0x5   :  { %v221_v11 = vld.sshfl [vmem:[%s378_s0] sm:$0x33 pattern:$0x76325410] }
   0x7   :  { %242 = vmatpush3.bf16.msra.mxu0 %v265_v3 }
   0x8   :  { %243 = vmatprep.subr.bf16.mxu0 %v266_v4 }
   0xb   :  { %244 = vmatpush3.bf16.msra.mxu0 %v267_v5 }
   0xc   :  { %245 = vmatprep.subr.bf16.mxu0 %v268_v6 }
   0xf   :  { %246 = vmatpush3.bf16.msra.mxu0 %v269_v7 }
  0x10   :  { %247 = vmatprep.subr.bf16.mxu0 %v270_v8 }
  0x11   :  { %8 = vsyncpa [#allocation3], 0  ;;  %v25_v12 = vcombine.high %v221_v11, %v221_v11  ;;  %v273_v13 = vld [vmem:[%s379_s1 + $0x10] sm:$0xff]   ;;  %v274_v15 = vld [vmem:[%s379_s1 + $0x48] sm:$0xff]   ;;  %v28_v19 = vpack.c.bf16 %v221_v11, %v221_v11  ;;  %s300_s20 = smov [#allocation2]   ;;  %vm205_vm0 = vcmask 517120  }
  0x12   :  { %v275_v16 = vld [vmem:[%s379_s1 + $0x8] sm:$0xff]   ;;  %v276_v17 = vld [vmem:[%s379_s1 + $0x40] sm:$0xff]   ;;  %s213_s21 = sshll.u32 %s300_s20, 4  ;;  %s214_s21 = int_to_ptr.vmem [resolvable:$true] %s213_s21 }
  0x13   :  { %248 = vmatpush3.bf16.msra.mxu0 %v271_v9  ;;  %v29_v14 = vpack.c.bf16 %v25_v12, %v25_v12  ;;  %v277_v18 = vld [vmem:[%s379_s1] sm:$0xff]   ;;  %s278_s1 = scalar_lea.vmem %s214_s21, 32  ;;  %p283_p1 = scmp.lt.s32.totalorder %s214_s21, %s214_s21 }
  0x14   :  { %249 = vmatprep.subr.bf16.mxu0 %v272_v10  ;;  %v222_v21 = vld [vmem:[%s380_s2] ss:$0 sm:$0xff]  ;;  %p279_p0 = scmp.ne.s32.totalorder %s214_s21, %s278_s1  ;;  %p284_p2 = scmp.lt.s32.totalorder %s278_s1, %s278_s1 }
  0x15   :  { %197 = vmatprep.mubr.bf16.mxu0 %v29_v14 }
  0x16   :  { %p285_p3 = por %p284_p2, %p283_p1 }
  0x17   :  { %250 = vmatpush3.bf16.msra.mxu0 %v273_v13 }
  0x18   :  { %251 = vmatprep.subr.bf16.mxu0 %v274_v15  ;;  %p286_p4 = pnand %p285_p3, %p279_p0 }
  0x1b   :  { %252 = vmatpush3.bf16.msra.mxu0 %v275_v16 }
  0x1c   :  { %253 = vmatprep.subr.bf16.mxu0 %v276_v17 }
  0x1f   :  { %254 = vmatpush3.bf16.msra.mxu0 %v277_v18 }
  0x22   :  { %198 = vmatmul.mubr.bf16.vlgmr.msra.gmra.mxu0 %v28_v19 }
  0xe2   :  { %v255_v20 = vpop.f32.mrf.mxu0 }
  0xe4   :  { %v256_v22 = vpop.f32.mrf.mxu0 }
  0xe5   :  { %v257_v23 = vadd.f32 %v256_v22, %v255_v20 }
  0xe6   :  { %v258_v24 = vpop.f32.mrf.mxu0 }
  0xe7   :  { %v200_v25 = vadd.f32 %v257_v23, %v222_v21 }
  0xe8   :  { %v259_v26 = vpop.f32.mrf.mxu0 }
  0xe9   :  { %206 = vst.msk [vmem:[#allocation2] sm:$0x3] %vm205_vm0, %v200_v25 }
  0xea   :  { %289 = shalt.err (!%p286_p4)
}
  0xeb   :  { %216 = dma.vmem_to_hbm [thread:$0]  %s214_s21, 32, %s381_s3, [#allocation3]  }
  0xec   :  { %298 = dma.done.wait [#allocation3], 32  }
  0xed   :  { %299 = vsyncadd [#allocation3], 4294967264 }
  0xee   :  { %220 = vsyncpa [#allocation3], 1 }

</bundles_post_ra>
